<compile_context>
chip_gen: v7x
topology: tpu7x:2x2x1
jax: 0.10.0
libtpu: 0.0.40
codegen_flags: <defaults>
</compile_context>

<pallas_src>
import jax
import jax.numpy as jnp
from jax import lax
from jax.experimental import pallas as pl
from jax.experimental.pallas import tpu as pltpu

# ---- tvcr grid / ML parameters (deterministic, mirrors OptTvcr.__init__) ----
R0 = 2.0          # first tvcr grid point
DR = 1.0          # tvcr grid spacing
NR = 8            # number of tvcr grid points  -> grid = [2, 3, ..., 9]
COMP_R_MIN = 2.0
COMP_R_MAX = 9.0
CHARGE_WEIGHT = 1.0   # params['charge_weight']
LANE = 128            # lane-dense padding target for the atom axis

INIT_DICT = {1: (2.5, 3.0), 6: (7.0, 2.7), 7: (8.0, 2.2),
             8: (8.0, 2.3), 14: (3.3, 7.6)}


def _round_up(x, m):
    return (x + m - 1) // m * m


# ----------------------------- kernel ----------------------------------------
def _hat_weights(r_row, a_pad):
    """Hat (linear-interp) weights of radii row (1, A_pad) on the tvcr grid.

    Returns (NR, A_pad): grid points on sublanes, atoms on lanes (lane dense).
    Zero radii (padded atoms) give all-zero columns; nonzero radii are clamped
    to the grid range so boundary radii take the edge table value.
    TODO(synk): verify edge-clamp matches torch TvcrFeed boundary behavior.
    """
    g = R0 + DR * lax.broadcasted_iota(jnp.int32, (NR, a_pad), 0).astype(jnp.float32)
    r_hi = R0 + DR * (NR - 1)
    r_eff = jnp.where(r_row > 0.0, jnp.clip(r_row, R0, r_hi), r_row)
    return jnp.maximum(0.0, 1.0 - jnp.abs(r_eff - g) * (1.0 / DR))


def hs_build_kernel(compr_ref, dist_ref, tab_ref, ham_ref, over_ref, pred_ref):
    """Per-molecule H/S build via two-variable interpolation + charge proxy."""
    a_pad = ham_ref.shape[-1]
    c = compr_ref[0]                               # (2, A_pad), atoms on lanes
    w1 = _hat_weights(c[0:1, :], a_pad)            # wavefunction radii  (NR, A_pad)
    w2 = _hat_weights(c[1:2, :], a_pad)            # density radii       (NR, A_pad)

    # Stage 1: single MXU push for both tables:  [Th ; Ts] @ W2 -> (2*NR, A_pad)
    p = lax.dot_general(tab_ref[...], w2, (((1,), (0,)), ((), ())),
                        preferred_element_type=jnp.float32)

    # Stage 2: bilinear interpolation, contracting the NR axes directly
    # (no materialized XLU transpose).  Result (A_pad, A_pad).
    dn = (((0,), (0,)), ((), ()))
    h_i = lax.dot_general(w1, p[0:NR, :], dn, preferred_element_type=jnp.float32)
    s_i = lax.dot_general(w1, p[NR:2 * NR, :], dn, preferred_element_type=jnp.float32)

    decay = jnp.exp(-dist_ref[0])                  # distance dependence (diag -> 1)
    ham = h_i * decay
    over = s_i * decay
    ham_ref[0] = ham
    over_ref[0] = over

    # TODO(synk): real Dftb1 generalized eigensolver is not Pallas-able;
    # Mulliken-like charge proxy  q_a = sum_j H_aj * S_aj,  done as a trans-B
    # MXU matmul so atoms land on lanes with no XLU transpose / reduce.
    m = ham * over
    ones_row = jnp.ones((1, a_pad), jnp.float32)
    pred_ref[0] = lax.dot_general(ones_row, m, (((1,), (1,)), ((), ())),
                                  preferred_element_type=jnp.float32)


# ----------------------------- wrappers ---------------------------------------
def build_hs(compr_lanes, dist_pad, hs_tables):
    """Fused Pallas call: H/S build + charge proxy, one grid step per molecule.

    compr_lanes: (B, 2, A_pad)  atoms on lanes
    dist_pad:    (B, A_pad, A_pad)
    hs_tables:   (2*NR, NR)     stacked [H ; S] two-center tables
    """
    B, _, a_pad = compr_lanes.shape
    out_shape = (
        jax.ShapeDtypeStruct((B, a_pad, a_pad), jnp.float32),   # ham
        jax.ShapeDtypeStruct((B, a_pad, a_pad), jnp.float32),   # over
        jax.ShapeDtypeStruct((B, 1, a_pad), jnp.float32),       # pred charge proxy
    )
    return pl.pallas_call(
        hs_build_kernel,
        out_shape=out_shape,
        grid_spec=pltpu.PrefetchScalarGridSpec(
            num_scalar_prefetch=0,
            grid=(B,),
            in_specs=[
                pl.BlockSpec((1, 2, a_pad), lambda b: (b, 0, 0)),
                pl.BlockSpec((1, a_pad, a_pad), lambda b: (b, 0, 0)),
                pl.BlockSpec((2 * NR, NR), lambda b: (0, 0)),
            ],
            out_specs=[
                pl.BlockSpec((1, a_pad, a_pad), lambda b: (b, 0, 0)),
                pl.BlockSpec((1, a_pad, a_pad), lambda b: (b, 0, 0)),
                pl.BlockSpec((1, 1, a_pad), lambda b: (b, 0, 0)),
            ],
        ),
        compiler_params=pltpu.CompilerParams(
            dimension_semantics=("parallel",)),      # v7x: shard molecules on 2 TCs
    )(compr_lanes, dist_pad, hs_tables)


@jax.jit
def opt_tvcr_step(compr, dist, h_table, s_table, ref_charge, mask):
    """One OptTvcr._update_train forward pass (no autograd / optimizer.step)."""
    B, A, _ = compr.shape
    a_pad = _round_up(max(A, 1), LANE)

    # Layout plumbing (trivial, fused by XLA): atoms -> lanes, pad A to 128,
    # stack the H and S tables so the kernel does one first-stage MXU push.
    compr_lanes = jnp.transpose(compr, (0, 2, 1))                     # (B, 2, A)
    compr_lanes = jnp.pad(compr_lanes, ((0, 0), (0, 0), (0, a_pad - A)))
    dist_pad = jnp.pad(dist, ((0, 0), (0, a_pad - A), (0, a_pad - A)))
    hs_tables = jnp.concatenate([h_table, s_table], axis=0)           # (2*NR, NR)

    ham_p, over_p, pred_p = build_hs(compr_lanes, dist_pad, hs_tables)
    ham = ham_p[:, :A, :A]
    over = over_p[:, :A, :A]
    pred = pred_p[:, :, :A]

    # criterion (weighted masked MSE, reduction='mean' over real atoms) and
    # Model._check('OptTvcr'); ~100 floats -> plain JAX, fused by XLA (cheaper
    # than extra pallas_call launches).
    se = jnp.sum(jnp.square(pred - ref_charge) * mask)
    n = jnp.maximum(jnp.sum(mask), 1.0)              # guard 0/0 -> NaN
    loss = CHARGE_WEIGHT * se / n

    # torch: clamp only triggered if any *nonzero* radius violates the bound;
    # restrict the clamp itself to nonzero entries so the zero padding
    # sentinel of padded atoms is preserved (they must stay out of H/S).
    nz = compr != 0.0
    any_min = jnp.any(nz & (compr < COMP_R_MIN))
    any_max = jnp.any(nz & (compr > COMP_R_MAX))
    compr_checked = jnp.where(any_min & nz, jnp.maximum(compr, COMP_R_MIN), compr)
    compr_checked = jnp.where(any_max & nz, jnp.minimum(compr_checked, COMP_R_MAX),
                              compr_checked)
    return ham, over, pred, loss, compr_checked


# ----------------------------- example run -----------------------------------
def _init_compr(atomic_numbers):
    """OptTvcr.__init__: per-atom (wavefunction, density) radii from init_dict."""
    B, A = atomic_numbers.shape
    compr = jnp.zeros((B, A, 2), jnp.float32)
    for z, (r1, r2) in INIT_DICT.items():
        m = (atomic_numbers == z)[..., None]
        compr = jnp.where(m, jnp.asarray([r1, r2], jnp.float32), compr)
    return compr


if __name__ == "__main__":
    B, A = 2, 16   # batch of molecules, padded atom count

    # deterministic "geometry": atomic numbers with zero padding
    atomic_numbers = jnp.array(
        [[6, 1, 1, 1, 1, 8, 1, 7, 0, 0, 0, 0, 0, 0, 0, 0],
         [14, 8, 8, 7, 1, 1, 6, 1, 1, 8, 0, 0, 0, 0, 0, 0]], jnp.int32)
    mask = (atomic_numbers != 0).astype(jnp.float32).reshape(B, 1, A)

    key = jax.random.PRNGKey(0)
    k_pos, k_h, k_s, k_ref = jax.random.split(key, 4)

    # positions -> pairwise distances (diag = 0)
    pos = 2.0 * jax.random.normal(k_pos, (B, A, 3), jnp.float32)
    diff = pos[:, :, None, :] - pos[:, None, :, :]
    dist = jnp.sqrt(jnp.sum(diff * diff, axis=-1) + 1e-12)
    dist = dist * (1.0 - jnp.eye(A, dtype=jnp.float32))

    # deterministic two-center integral tables on the tvcr grid
    h_table = 0.1 * jax.random.normal(k_h, (NR, NR), jnp.float32) - 0.3
    s_table = 0.05 * jax.random.normal(k_s, (NR, NR), jnp.float32) + 0.2

    # reference target (e.g. Mulliken charges), zero on padded atoms
    ref_charge = jax.random.normal(k_ref, (B, 1, A), jnp.float32) * mask

    compr = _init_compr(atomic_numbers)

    ham, over, pred, loss, compr_checked = opt_tvcr_step(
        compr, dist, h_table, s_table, ref_charge, mask)
    jax.block_until_ready((ham, over, pred, loss, compr_checked))

    assert ham.shape == (B, A, A) and over.shape == (B, A, A)
    assert pred.shape == (B, 1, A) and compr_checked.shape == (B, A, 2)
    assert jnp.isfinite(loss)
    print("KERNEL_OK")
</pallas_src>

<mosaic_0001>
module attributes {stable_mosaic.version = 11 : i64} {
  func.func @hs_build_kernel(%arg0: i32, %arg1: memref<1x2x128xf32, #tpu.memory_space<vmem>>, %arg2: memref<1x128x128xf32, #tpu.memory_space<vmem>>, %arg3: memref<16x8xf32, #tpu.memory_space<vmem>>, %arg4: memref<1x128x128xf32, #tpu.memory_space<vmem>>, %arg5: memref<1x128x128xf32, #tpu.memory_space<vmem>>, %arg6: memref<1x1x128xf32, #tpu.memory_space<vmem>>) attributes {dimension_semantics = [#tpu.dimension_semantics<parallel>], iteration_bounds = array<i64: 2>, scalar_prefetch = 0 : i64, scratch_operands = 0 : i64, tpu.core_type = #tpu.core_type<tc>, window_params = [{transform_indices = @transform_0, window_bounds = array<i64: 1, 2, 128>}, {transform_indices = @transform_1, window_bounds = array<i64: 1, 128, 128>}, {pipeline_mode = #tpu.pipeline_mode<synchronous>, transform_indices = @transform_2, window_bounds = array<i64: 16, 8>}, {transform_indices = @transform_3, window_bounds = array<i64: 1, 128, 128>}, {transform_indices = @transform_4, window_bounds = array<i64: 1, 128, 128>}, {transform_indices = @transform_5, window_bounds = array<i64: 1, 1, 128>}]} {
    %c0 = arith.constant 0 : index
    %c0_0 = arith.constant 0 : index
    %c0_1 = arith.constant 0 : index
    %0 = vector.load %arg1[%c0, %c0_0, %c0_1] : memref<1x2x128xf32, #tpu.memory_space<vmem>>, vector<1x2x128xf32>
    %1 = vector.shape_cast %0 : vector<1x2x128xf32> to vector<2x128xf32>
    %2 = vector.extract_strided_slice %1 {offsets = [0, 0], sizes = [1, 128], strides = [1, 1]} : vector<2x128xf32> to vector<1x128xf32>
    %3 = tpu.iota {dimensions = array<i32: 0>} : vector<8x128xi32>
    %4 = arith.sitofp %3 : vector<8x128xi32> to vector<8x128xf32>
    %cst = arith.constant 1.000000e+00 : f32
    %5 = vector.broadcast %cst : f32 to vector<8x128xf32>
    %6 = arith.mulf %5, %4 : vector<8x128xf32>
    %cst_2 = arith.constant 2.000000e+00 : f32
    %7 = vector.broadcast %cst_2 : f32 to vector<8x128xf32>
    %8 = arith.addf %7, %6 : vector<8x128xf32>
    %cst_3 = arith.constant 0.000000e+00 : f32
    %9 = vector.broadcast %cst_3 : f32 to vector<1x128xf32>
    %10 = arith.cmpf ogt, %2, %9 : vector<1x128xf32>
    %cst_4 = arith.constant 2.000000e+00 : f32
    %cst_5 = arith.constant 9.000000e+00 : f32
    %11 = vector.broadcast %cst_4 : f32 to vector<1x128xf32>
    %12 = arith.maximumf %11, %2 : vector<1x128xf32>
    %13 = vector.broadcast %cst_5 : f32 to vector<1x128xf32>
    %14 = arith.minimumf %13, %12 : vector<1x128xf32>
    %15 = arith.select %10, %14, %2 : vector<1x128xi1>, vector<1x128xf32>
    %16 = vector.broadcast %15 : vector<1x128xf32> to vector<8x128xf32>
    %17 = arith.subf %16, %8 : vector<8x128xf32>
    %18 = math.absf %17 : vector<8x128xf32>
    %cst_6 = arith.constant 1.000000e+00 : f32
    %19 = vector.broadcast %cst_6 : f32 to vector<8x128xf32>
    %20 = arith.mulf %18, %19 : vector<8x128xf32>
    %cst_7 = arith.constant 1.000000e+00 : f32
    %21 = vector.broadcast %cst_7 : f32 to vector<8x128xf32>
    %22 = arith.subf %21, %20 : vector<8x128xf32>
    %cst_8 = arith.constant 0.000000e+00 : f32
    %23 = vector.broadcast %cst_8 : f32 to vector<8x128xf32>
    %24 = arith.maximumf %23, %22 : vector<8x128xf32>
    %25 = vector.extract_strided_slice %1 {offsets = [1, 0], sizes = [1, 128], strides = [1, 1]} : vector<2x128xf32> to vector<1x128xf32>
    %26 = tpu.iota {dimensions = array<i32: 0>} : vector<8x128xi32>
    %27 = arith.sitofp %26 : vector<8x128xi32> to vector<8x128xf32>
    %cst_9 = arith.constant 1.000000e+00 : f32
    %28 = vector.broadcast %cst_9 : f32 to vector<8x128xf32>
    %29 = arith.mulf %28, %27 : vector<8x128xf32>
    %cst_10 = arith.constant 2.000000e+00 : f32
    %30 = vector.broadcast %cst_10 : f32 to vector<8x128xf32>
    %31 = arith.addf %30, %29 : vector<8x128xf32>
    %cst_11 = arith.constant 0.000000e+00 : f32
    %32 = vector.broadcast %cst_11 : f32 to vector<1x128xf32>
    %33 = arith.cmpf ogt, %25, %32 : vector<1x128xf32>
    %cst_12 = arith.constant 2.000000e+00 : f32
    %cst_13 = arith.constant 9.000000e+00 : f32
    %34 = vector.broadcast %cst_12 : f32 to vector<1x128xf32>
    %35 = arith.maximumf %34, %25 : vector<1x128xf32>
    %36 = vector.broadcast %cst_13 : f32 to vector<1x128xf32>
    %37 = arith.minimumf %36, %35 : vector<1x128xf32>
    %38 = arith.select %33, %37, %25 : vector<1x128xi1>, vector<1x128xf32>
    %39 = vector.broadcast %38 : vector<1x128xf32> to vector<8x128xf32>
    %40 = arith.subf %39, %31 : vector<8x128xf32>
    %41 = math.absf %40 : vector<8x128xf32>
    %cst_14 = arith.constant 1.000000e+00 : f32
    %42 = vector.broadcast %cst_14 : f32 to vector<8x128xf32>
    %43 = arith.mulf %41, %42 : vector<8x128xf32>
    %cst_15 = arith.constant 1.000000e+00 : f32
    %44 = vector.broadcast %cst_15 : f32 to vector<8x128xf32>
    %45 = arith.subf %44, %43 : vector<8x128xf32>
    %cst_16 = arith.constant 0.000000e+00 : f32
    %46 = vector.broadcast %cst_16 : f32 to vector<8x128xf32>
    %47 = arith.maximumf %46, %45 : vector<8x128xf32>
    %c0_17 = arith.constant 0 : index
    %c0_18 = arith.constant 0 : index
    %48 = vector.load %arg3[%c0_17, %c0_18] : memref<16x8xf32, #tpu.memory_space<vmem>>, vector<16x8xf32>
    %cst_19 = arith.constant dense<0.000000e+00> : vector<16x128xf32>
    %49 = tpu.matmul %48, %47, %cst_19 {dimension_numbers = #tpu.dot_dimension_numbers<[1], [0], [0], [1], [0, 0, 1, 1], [], []>} : vector<16x8xf32>, vector<8x128xf32>, vector<16x128xf32> -> vector<16x128xf32>
    %50 = vector.extract_strided_slice %49 {offsets = [0, 0], sizes = [8, 128], strides = [1, 1]} : vector<16x128xf32> to vector<8x128xf32>
    %cst_20 = arith.constant dense<0.000000e+00> : vector<128x128xf32>
    %51 = tpu.matmul %24, %50, %cst_20 {dimension_numbers = #tpu.dot_dimension_numbers<[0], [0], [1], [1], [0, 1, 1, 1], [], []>} : vector<8x128xf32>, vector<8x128xf32>, vector<128x128xf32> -> vector<128x128xf32>
    %52 = vector.extract_strided_slice %49 {offsets = [8, 0], sizes = [8, 128], strides = [1, 1]} : vector<16x128xf32> to vector<8x128xf32>
    %cst_21 = arith.constant dense<0.000000e+00> : vector<128x128xf32>
    %53 = tpu.matmul %24, %52, %cst_21 {dimension_numbers = #tpu.dot_dimension_numbers<[0], [0], [1], [1], [0, 1, 1, 1], [], []>} : vector<8x128xf32>, vector<8x128xf32>, vector<128x128xf32> -> vector<128x128xf32>
    %c0_22 = arith.constant 0 : index
    %c0_23 = arith.constant 0 : index
    %c0_24 = arith.constant 0 : index
    %54 = vector.load %arg2[%c0_22, %c0_23, %c0_24] : memref<1x128x128xf32, #tpu.memory_space<vmem>>, vector<1x128x128xf32>
    %55 = vector.shape_cast %54 : vector<1x128x128xf32> to vector<128x128xf32>
    %cst_25 = arith.constant 0.000000e+00 : f32
    %56 = vector.broadcast %cst_25 : f32 to vector<128x128xf32>
    %57 = arith.subf %56, %55 : vector<128x128xf32>
    %58 = math.exp %57 : vector<128x128xf32>
    %59 = arith.mulf %51, %58 : vector<128x128xf32>
    %60 = arith.mulf %53, %58 : vector<128x128xf32>
    %c0_26 = arith.constant 0 : index
    %c0_27 = arith.constant 0 : index
    %c0_28 = arith.constant 0 : index
    %61 = vector.load %arg4[%c0_26, %c0_27, %c0_28] : memref<1x128x128xf32, #tpu.memory_space<vmem>>, vector<1x128x128xf32>
    %62 = vector.shape_cast %61 : vector<1x128x128xf32> to vector<128x128xf32>
    %63 = vector.shape_cast %59 : vector<128x128xf32> to vector<1x128x128xf32>
    tpu.vector_store %arg4[%c0_26, %c0_27, %c0_28], %63 {strides = array<i32>} : memref<1x128x128xf32, #tpu.memory_space<vmem>>, vector<1x128x128xf32>,
    %c0_29 = arith.constant 0 : index
    %c0_30 = arith.constant 0 : index
    %c0_31 = arith.constant 0 : index
    %64 = vector.load %arg5[%c0_29, %c0_30, %c0_31] : memref<1x128x128xf32, #tpu.memory_space<vmem>>, vector<1x128x128xf32>
    %65 = vector.shape_cast %64 : vector<1x128x128xf32> to vector<128x128xf32>
    %66 = vector.shape_cast %60 : vector<128x128xf32> to vector<1x128x128xf32>
    tpu.vector_store %arg5[%c0_29, %c0_30, %c0_31], %66 {strides = array<i32>} : memref<1x128x128xf32, #tpu.memory_space<vmem>>, vector<1x128x128xf32>,
    %67 = arith.mulf %59, %60 : vector<128x128xf32>
    %cst_32 = arith.constant 1.000000e+00 : f32
    %68 = vector.broadcast %cst_32 : f32 to vector<1x128xf32>
    %cst_33 = arith.constant dense<0.000000e+00> : vector<1x128xf32>
    %69 = tpu.matmul %68, %67, %cst_33 {dimension_numbers = #tpu.dot_dimension_numbers<[1], [1], [0], [0], [0, 0, 1, 0], [], []>} : vector<1x128xf32>, vector<128x128xf32>, vector<1x128xf32> -> vector<1x128xf32>
    %c0_34 = arith.constant 0 : index
    %c0_35 = arith.constant 0 : index
    %c0_36 = arith.constant 0 : index
    %70 = vector.load %arg6[%c0_34, %c0_35, %c0_36] : memref<1x1x128xf32, #tpu.memory_space<vmem>>, vector<1x1x128xf32>
    %71 = vector.shape_cast %70 : vector<1x1x128xf32> to vector<1x128xf32>
    %72 = vector.shape_cast %69 : vector<1x128xf32> to vector<1x1x128xf32>
    tpu.vector_store %arg6[%c0_34, %c0_35, %c0_36], %72 {strides = array<i32>} : memref<1x1x128xf32, #tpu.memory_space<vmem>>, vector<1x1x128xf32>,
    return
  }
  func.func @transform_0(%arg0: i32) -> (i32, i32, i32) {
    %c0_i32 = arith.constant 0 : i32
    %c0_i32_0 = arith.constant 0 : i32
    %c0_i32_1 = arith.constant 0 : i32
    return %arg0, %c0_i32, %c0_i32_0 : i32, i32, i32
  }
  func.func @transform_1(%arg0: i32) -> (i32, i32, i32) {
    %c0_i32 = arith.constant 0 : i32
    %c0_i32_0 = arith.constant 0 : i32
    %c0_i32_1 = arith.constant 0 : i32
    return %arg0, %c0_i32, %c0_i32_0 : i32, i32, i32
  }
  func.func @transform_2(%arg0: i32) -> (i32, i32) {
    %c0_i32 = arith.constant 0 : i32
    %c0_i32_0 = arith.constant 0 : i32
    %c0_i32_1 = arith.constant 0 : i32
    return %c0_i32, %c0_i32_0 : i32, i32
  }
  func.func @transform_3(%arg0: i32) -> (i32, i32, i32) {
    %c0_i32 = arith.constant 0 : i32
    %c0_i32_0 = arith.constant 0 : i32
    %c0_i32_1 = arith.constant 0 : i32
    return %arg0, %c0_i32, %c0_i32_0 : i32, i32, i32
  }
  func.func @transform_4(%arg0: i32) -> (i32, i32, i32) {
    %c0_i32 = arith.constant 0 : i32
    %c0_i32_0 = arith.constant 0 : i32
    %c0_i32_1 = arith.constant 0 : i32
    return %arg0, %c0_i32, %c0_i32_0 : i32, i32, i32
  }
  func.func @transform_5(%arg0: i32) -> (i32, i32, i32) {
    %c0_i32 = arith.constant 0 : i32
    %c0_i32_0 = arith.constant 0 : i32
    %c0_i32_1 = arith.constant 0 : i32
    return %arg0, %c0_i32, %c0_i32_0 : i32, i32, i32
  }
}

</mosaic_0001>

<bundles_post_ra>
// kernel: opt_tvcr_step.1
= control target key start
LH: loop header
LB: loop body
LE: loop exit
PB: predicated region body
PF: predicated region fallthrough
CT: control target
= control target key end

     0   :  { %s1389_s18 = smov 0   ;;  %s1533_s0 = inlined_call_operand.vmem [shape: f32[2,2,128], index: 0, kind: input, shape index: {}]   ;;  %s1534_s1 = inlined_call_operand.vmem [shape: f32[2,128,128], index: 1, kind: input, shape index: {}]   ;;  %s1535_s2 = inlined_call_operand.vmem [shape: f32[16,8], index: 2, kind: input, shape index: {}]   ;;  %s1536_s3 = inlined_call_operand.vmem [shape: f32[2,128,128], index: 3, kind: output, shape index: {0}]   ;;  %s1537_s4 = inlined_call_operand.vmem [shape: f32[2,128,128], index: 4, kind: output, shape index: {1}]   ;;  %s1538_s5 = inlined_call_operand.vmem [shape: f32[2,1,128], index: 5, kind: output, shape index: {2}]  }
   0x1 LB: > { %s1082_s19 = sadd.s32 4294967295, %s1353_s18   ;;  %p1086_p0 = scmp.ge.s32.totalorder %s1353_s18, 1  ;;  %s1353_s18 = sphi %s1389_s18, %s16_s18  }
   0x2   : > { %p201_p1 = scmp.lt.s32.totalorder %s1353_s18, 3 }
   0x4   : > { %p202_p2 = pnand %p1086_p0, %p201_p1 }
   0x5   : > { %p241_p3 = scmp.lt.s32.totalorder (!%p202_p2), %s1082_s19, 1  ;;  %v264_v0 = vlaneseq (!%p202_p2)  ;;  %v288_v1 = vld [vmem:[%s1535_s2] sm:$0xff] (!%p202_p2)  ;;  %vm290_vm0 = vcmask (!%p202_p2), 64512   ;;  %v289_v21 = vld [vmem:[%s1535_s2 + $0x8] sm:$0xff] (!%p202_p2)  ;;  %v1355_v40 = vmov (!%p202_p2), 0.0|0.0   ;;  %vm1356_vm2 = vmmov (!%p202_p2), 0  }
   0x6   : > { %205 = sbr.rel (%p202_p2) target bundleno = 744 (0x2e8), region = 32  ;;  %1189 = vmatprep.mubr.msk.f32.mxu0 (!%p202_p2), %vm290_vm0, %v288_v1  ;;  %v1357_v41 = vmov (!%p202_p2), 0.0  }
   0x7   : > { %v265_v2 = vshrl.u32 (!%p202_p2), %v264_v0, 7 }
   0x9   : > { %v266_v4 = vcvt.s32.f32 (!%p202_p2), %v265_v2  ;;  %v282_v6 = vsub.s32 (!%p202_p2), 1, %v265_v2  ;;  %v274_v7 = vsub.s32 (!%p202_p2), 0, %v265_v2 }
   0xb   : > { %v267_v9 = vadd.f32 (!%p202_p2), 2.0, %v266_v4 }
   0xd   : > { %s1540_s19 = smov (!%p241_p3, %s1082_s19), 1 }
   0xe   : > { %s1087_s22 = sshll.u32 %s1540_s19, 1  ;;  %s1445_s28 = sshll.u32 %s1540_s19, 7 }
   0xf   : > { %s244_s25 = scalar_lea.vmem %s1533_s0, %s1087_s22  ;;  %s1451_s6 = scalar_lea.vmem %s1534_s1, %s1445_s28 }
  0x10   : > { %v263_v3 = vld [vmem:[%s244_s25] sm:$0x3]  ;;  %v743_v42 = vld [vmem:[%s1451_s6 + $0x8] sm:$0xff]  ;;  %v745_v46 = vld [vmem:[%s1451_s6 + $0x18] sm:$0xff]  ;;  %s1469_s9 = scalar_lea.vmem %s1537_s4, %s1445_s28  ;;  %s1475_s12 = scalar_lea.vmem %s1536_s3, %s1445_s28 }
  0x11   : > { %v269_v5 = vmax.f32 %v263_v3, 2.0  ;;  %vm268_vm1 = vcmp.gt.f32.partialorder %v263_v3, 0.0  ;;  %v742_v43 = vld [vmem:[%s1451_s6] sm:$0xff]  ;;  %v759_v44 = vsub.f32 0.0, %v743_v42  ;;  %v744_v47 = vld [vmem:[%s1451_s6 + $0x10] sm:$0xff]  ;;  %v761_v49 = vsub.f32 0.0, %v745_v46  ;;  %s262_s15 = scalar_lea.vmem %s1538_s5, %s1540_s19 }
  0x12   : > { %v758_v45 = vsub.f32 0.0, %v742_v43  ;;  %v760_v51 = vsub.f32 0.0, %v744_v47  ;;  %v747_v52 = vld [vmem:[%s1451_s6 + $0x28] sm:$0xff]  ;;  %v746_v53 = vld [vmem:[%s1451_s6 + $0x20] sm:$0xff]  ;;  %v749_v58 = vld [vmem:[%s1451_s6 + $0x38] sm:$0xff] }
  0x13   : > { %v270_v8 = vmin.f32 %v269_v5, 9.0  ;;  %v776_v48 = vmul.f32 1.442695, %v759_v44  ;;  %v780_v54 = vmul.f32 1.442695, %v761_v49  ;;  %v763_v55 = vsub.f32 0.0, %v747_v52 }
  0x14   : > { %v774_v50 = vmul.f32 1.442695, %v758_v45  ;;  %v778_v56 = vmul.f32 1.442695, %v760_v51  ;;  %v762_v57 = vsub.f32 0.0, %v746_v53  ;;  %v748_v59 = vld [vmem:[%s1451_s6 + $0x30] sm:$0xff] }
  0x15   : > { %v271_v10 = vsel %vm268_vm1, %v270_v8, %v263_v3  ;;  %1315 = vpow2.f32 %v776_v48  ;;  %v784_v60 = vmul.f32 1.442695, %v763_v55  ;;  %v765_v61 = vsub.f32 0.0, %v749_v58  ;;  %v751_v0 = vld [vmem:[%s1451_s6 + $0x48] sm:$0xff]  ;;  %v750_v1 = vld [vmem:[%s1451_s6 + $0x40] sm:$0xff]  ;;  %v753_v4 = vld [vmem:[%s1451_s6 + $0x58] sm:$0xff] }
  0x16   : > { %v283_v11 = vrot.slane %v271_v10, %v282_v6  ;;  %v275_v12 = vrot.slane %v271_v10, %v274_v7  ;;  %1317 = vpow2.f32 %v774_v50  ;;  %v782_v62 = vmul.f32 1.442695, %v762_v57  ;;  %v752_v7 = vld [vmem:[%s1451_s6 + $0x50] sm:$0xff] }
  0x17   : > { %1319 = vpow2.f32 %v780_v54  ;;  %v764_v63 = vsub.f32 0.0, %v748_v59  ;;  %v788_v2 = vmul.f32 1.442695, %v765_v61  ;;  %v767_v3 = vsub.f32 0.0, %v751_v0  ;;  %v756_v42 = vld [vmem:[%s1451_s6 + $0x70] sm:$0xff] }
  0x18   : > { %v284_v13 = vsub.f32 %v283_v11, %v267_v9  ;;  %v276_v14 = vsub.f32 %v275_v12, %v267_v9  ;;  %1321 = vpow2.f32 %v778_v56  ;;  %v766_v6 = vsub.f32 0.0, %v750_v1 }
  0x19   : > { %1323 = vpow2.f32 %v784_v60  ;;  %v786_v5 = vmul.f32 1.442695, %v764_v63  ;;  %v769_v10 = vsub.f32 0.0, %v753_v4  ;;  %v792_v12 = vmul.f32 1.442695, %v767_v3 }
  0x1a   : > { %v285_v15 = vand.u32 2147483647, %v284_v13  ;;  %v277_v16 = vand.u32 2147483647, %v276_v14  ;;  %1325 = vpow2.f32 %v782_v62  ;;  %v768_v13 = vsub.f32 0.0, %v752_v7 }
  0x1b   : > { %1327 = vpow2.f32 %v788_v2  ;;  %v772_v55 = vsub.f32 0.0, %v756_v42 }
  0x1c   : > { %v286_v17 = vsub.f32 1.0, %v285_v15  ;;  %v278_v18 = vsub.f32 1.0, %v277_v16  ;;  %1329 = vpow2.f32 %v786_v5 }
  0x1d   : > { %1331 = vpow2.f32 %v792_v12 }
  0x1e   : > { %v287_v19 = vmax.f32 %v286_v17, 0.0  ;;  %v279_v20 = vmax.f32 %v278_v18, 0.0  ;;  %v790_v17 = vmul.f32 1.442695, %v766_v6  ;;  %v755_v18 = vld [vmem:[%s1451_s6 + $0x68] sm:$0xff] }
  0x1f   : > { %v1316_v8 = vpop.eup %1315  ;;  %v802_v6 = vmul.f32 1.442695, %v772_v55 }
  0x20   : > { %1187 = vmatprep.subr.mxu0 %v287_v19  ;;  %372 = vxpose.xlu0.b32.start.end [1/1] (short) %v279_v20, 128  ;;  %v1318_v9 = vpop.eup %1317  ;;  %1333 = vpow2.f32 %v790_v17 }
  0x21   : > { %1188 = vmatpush3.msra.mxu0 %v287_v19  ;;  %v1320_v19 = vpop.eup %1319 }
  0x22   : > { %1190 = vmatmul.mubr.msk.f32.vlgmr.msra.gmra.mrb[0].mxu0 %vm290_vm0, %v289_v21 }
  0xa0   : > { %v388_v22 = vpop.trf.xlu0 }
  0xa1   : > { %1194 = vmatprep.mubr.msk.f32.mxu1 %vm290_vm0, %v388_v22  ;;  %1220 = vmatprep.mubr.msk.f32.mxu0 %vm290_vm0, %v388_v22 }
  0xa4   : > { %v389_v23 = vpop.trf.xlu0 }
  0xa8   : > { %v390_v24 = vpop.trf.xlu0 }
  0xac   : > { %v391_v25 = vpop.trf.xlu0 }
  0xb0   : > { %v392_v26 = vpop.trf.xlu0 }
  0xb4   : > { %v393_v27 = vpop.trf.xlu0 }
  0xb8   : > { %v394_v28 = vpop.trf.xlu0 }
  0xbc   : > { %v395_v29 = vpop.trf.xlu0 }
  0xc0   : > { %v396_v30 = vpop.trf.xlu0 }
  0xc4   : > { %v397_v31 = vpop.trf.xlu0 }
  0xc8   : > { %v398_v32 = vpop.trf.xlu0 }
  0xcc   : > { %v399_v35 = vpop.trf.xlu0 }
  0xd0   : > { %v400_v36 = vpop.trf.xlu0 }
  0xd4   : > { %v401_v37 = vpop.trf.xlu0 }
  0xd8   : > { %v402_v38 = vpop.trf.xlu0 }
  0xdc   : > { %v403_v39 = vpop.trf.xlu0 }
  0xf5   : > { %v1191_v33 = vpop.f32.mrb[0].mxu0 }
  0xf6   : > { %v363_v34 = vpop.f32.mrb[1].mxu0  ;;  %1218 = vmatprep.subr.mxu0 %v1191_v33 }
  0xf7   : > { %1192 = vmatprep.subr.mxu1 %v363_v34  ;;  %1219 = vmatpush3.msra.mxu0 %v1191_v33 }
  0xf8   : > { %1193 = vmatpush3.msra.mxu1 %v363_v34  ;;  %1221 = vmatmul.mubr.msk.f32.vlgmr.msra.gmra.mrb[2].mxu0 %vm290_vm0, %v389_v23 }
  0xf9   : > { %1195 = vmatmul.mubr.msk.f32.vlgmr.msra.gmra.mrb[0].mxu1 %vm290_vm0, %v389_v23  ;;  %1223 = vmatprep.mubr.msk.f32.mxu0 %vm290_vm0, %v390_v24  ;;  %v754_v23 = vld [vmem:[%s1451_s6 + $0x60] sm:$0xff] }
  0xfa   : > { %1197 = vmatprep.mubr.msk.f32.mxu1 %vm290_vm0, %v390_v24  ;;  %1279 = vmatprep.subr.bf16.mxu1 %v1355_v40  ;;  %v1322_v24 = vpop.eup %1321 }
  0xfc   : > { %1224 = vmatmul.mubr.msk.f32.gmra.mrb[4].mxu0 %vm290_vm0, %v391_v25 }
  0xfd   : > { %1198 = vmatmul.mubr.msk.f32.gmra.mrb[2].mxu1 %vm290_vm0, %v391_v25  ;;  %1226 = vmatprep.mubr.msk.f32.mxu0 %vm290_vm0, %v392_v26 }
  0xfe   : > { %1200 = vmatprep.mubr.msk.f32.mxu1 %vm290_vm0, %v392_v26  ;;  %v796_v26 = vmul.f32 1.442695, %v769_v10 }
 0x100   : > { %1227 = vmatmul.mubr.msk.f32.gmra.mrb[6].mxu0 %vm290_vm0, %v393_v27  ;;  %1335 = vpow2.f32 %v796_v26 }
 0x101   : > { %1201 = vmatmul.mubr.msk.f32.gmra.mrb[4].mxu1 %vm290_vm0, %v393_v27  ;;  %1229 = vmatprep.mubr.msk.f32.mxu0 %vm290_vm0, %v394_v28 }
 0x102   : > { %1203 = vmatprep.mubr.msk.f32.mxu1 %vm290_vm0, %v394_v28 }
 0x104   : > { %1230 = vmatmul.mubr.msk.f32.gmra.mrb[8].mxu0 %vm290_vm0, %v395_v29 }
 0x105   : > { %1204 = vmatmul.mubr.msk.f32.gmra.mrb[6].mxu1 %vm290_vm0, %v395_v29  ;;  %1232 = vmatprep.mubr.msk.f32.mxu0 %vm290_vm0, %v396_v30  ;;  %v794_v29 = vmul.f32 1.442695, %v768_v13 }
 0x106   : > { %1206 = vmatprep.mubr.msk.f32.mxu1 %vm290_vm0, %v396_v30  ;;  %v771_v30 = vsub.f32 0.0, %v755_v18 }
 0x107   : > { %1337 = vpow2.f32 %v794_v29 }
 0x108   : > { %1233 = vmatmul.mubr.msk.f32.gmra.mrb[10].mxu0 %vm290_vm0, %v397_v31  ;;  %v800_v48 = vmul.f32 1.442695, %v771_v30 }
 0x109   : > { %1207 = vmatmul.mubr.msk.f32.gmra.mrb[8].mxu1 %vm290_vm0, %v397_v31  ;;  %1235 = vmatprep.mubr.msk.f32.mxu0 %vm290_vm0, %v398_v32 }
 0x10a   : > { %1209 = vmatprep.mubr.msk.f32.mxu1 %vm290_vm0, %v398_v32  ;;  %1339 = vpow2.f32 %v800_v48 }
 0x10c   : > { %1236 = vmatmul.mubr.msk.f32.gmra.mrb[12].mxu0 %vm290_vm0, %v399_v35 }
 0x10d   : > { %1210 = vmatmul.mubr.msk.f32.gmra.mrb[10].mxu1 %vm290_vm0, %v399_v35  ;;  %1238 = vmatprep.mubr.msk.f32.mxu0 %vm290_vm0, %v400_v36  ;;  %v770_v35 = vsub.f32 0.0, %v754_v23 }
 0x10e   : > { %1212 = vmatprep.mubr.msk.f32.mxu1 %vm290_vm0, %v400_v36  ;;  %v757_v36 = vld [vmem:[%s1451_s6 + $0x78] sm:$0xff] }
 0x10f   : > { %v773_v49 = vsub.f32 0.0, %v757_v36  ;;  %v798_v54 = vmul.f32 1.442695, %v770_v35 }
 0x110   : > { %1239 = vmatmul.mubr.msk.f32.gmra.mrb[14].mxu0 %vm290_vm0, %v401_v37 }
 0x111   : > { %1213 = vmatmul.mubr.msk.f32.gmra.mrb[12].mxu1 %vm290_vm0, %v401_v37  ;;  %1241 = vmatprep.mubr.msk.f32.mxu0 %vm290_vm0, %v402_v38  ;;  %v1324_v37 = vpop.eup %1323  ;;  %v804_v1 = vmul.f32 1.442695, %v773_v49  ;;  %1341 = vpow2.f32 %v798_v54 }
 0x112   : > { %1215 = vmatprep.mubr.msk.f32.mxu1 %vm290_vm0, %v402_v38  ;;  %v1326_v43 = vpop.eup %1325 }
 0x113   : > { %v1328_v56 = vpop.eup %1327  ;;  %1343 = vpow2.f32 %v804_v1 }
 0x114   : > { %1242 = vmatmul.mubr.msk.f32.gmra.mrb[16].mxu0 %vm290_vm0, %v403_v39  ;;  %v1330_v60 = vpop.eup %1329  ;;  %1345 = vpow2.f32 %v802_v6 }
 0x115   : > { %1216 = vmatmul.mubr.msk.f32.gmra.mrb[14].mxu1 %vm290_vm0, %v403_v39  ;;  %v1332_v7 = vpop.eup %1331 }
 0x116   : > { %1276 = vmatprep.mubr.msk.f32.mxu1 %vm1356_vm2, %v1357_v41 }
 0x1cb   : > { %v1222_v11 = vpop.f32.mrb[2].mxu0 }
 0x1cc   : > { %v1196_v14 = vpop.f32.mrb[0].mxu1  ;;  %v823_v15 = vmul.f32 %v1316_v8, %v1222_v11  ;;  %v663_v16 = vpop.f32.mrb[3].mxu0 }
 0x1cd   : > { %v807_v20 = vmul.f32 %v1316_v8, %v1196_v14  ;;  %v518_v21 = vpop.f32.mrb[1].mxu1  ;;  %v822_v22 = vmul.f32 %v1318_v9, %v663_v16  ;;  %v1334_v11 = vpop.eup %1333 }
 0x1ce   : > { %855 = vst [vmem:[%s1469_s9 + $0x8] sm:$0xff] %v823_v15  ;;  %v806_v25 = vmul.f32 %v1318_v9, %v518_v21  ;;  %v1336_v16 = vpop.eup %1335 }
 0x1cf   : > { %839 = vst [vmem:[%s1475_s12 + $0x8] sm:$0xff] %v807_v20  ;;  %v871_v27 = vmul.f32 %v823_v15, %v807_v20  ;;  %854 = vst [vmem:[%s1469_s9] sm:$0xff] %v822_v22  ;;  %v1225_v28 = vpop.f32.mrb[4].mxu0  ;;  %v1338_v21 = vpop.eup %1337 }
 0x1d0   : > { %838 = vst [vmem:[%s1475_s12] sm:$0xff] %v806_v25  ;;  %v870_v31 = vmul.f32 %v822_v22, %v806_v25  ;;  %v1199_v32 = vpop.f32.mrb[2].mxu1  ;;  %v825_v33 = vmul.f32 %v1320_v19, %v1225_v28  ;;  %v673_v34 = vpop.f32.mrb[5].mxu0 }
 0x1d1   : > { %v809_v38 = vmul.f32 %v1320_v19, %v1199_v32  ;;  %v528_v39 = vpop.f32.mrb[3].mxu1  ;;  %v824_v41 = vmul.f32 %v1322_v24, %v673_v34 }
 0x1d2   : > { %v1280_v44 = vpack.c.bf16 %v871_v27, %v870_v31  ;;  %857 = vst [vmem:[%s1469_s9 + $0x18] sm:$0xff] %v825_v33  ;;  %v808_v45 = vmul.f32 %v1322_v24, %v528_v39 }
 0x1d3   : > { %841 = vst [vmem:[%s1475_s12 + $0x18] sm:$0xff] %v809_v38  ;;  %v873_v46 = vmul.f32 %v825_v33, %v809_v38  ;;  %856 = vst [vmem:[%s1469_s9 + $0x10] sm:$0xff] %v824_v41  ;;  %v1228_v47 = vpop.f32.mrb[6].mxu0  ;;  %v1340_v33 = vpop.eup %1339 }
 0x1d4   : > { %1281 = vmatpush3.bf16.xpose.msra.mxu1 %v1280_v44  ;;  %840 = vst [vmem:[%s1475_s12 + $0x10] sm:$0xff] %v808_v45  ;;  %v872_v50 = vmul.f32 %v824_v41, %v808_v45  ;;  %v1202_v51 = vpop.f32.mrb[4].mxu1  ;;  %v827_v52 = vmul.f32 %v1324_v37, %v1228_v47  ;;  %v683_v53 = vpop.f32.mrb[7].mxu0 }
 0x1d5   : > { %1282 = vmatprep.subr.bf16.mxu1 %v1355_v40  ;;  %v811_v57 = vmul.f32 %v1324_v37, %v1202_v51  ;;  %v538_v58 = vpop.f32.mrb[5].mxu1  ;;  %v826_v59 = vmul.f32 %v1326_v43, %v683_v53  ;;  %v1342_v37 = vpop.eup %1341 }
 0x1d6   : > { %v1283_v61 = vpack.c.bf16 %v873_v46, %v872_v50  ;;  %859 = vst [vmem:[%s1469_s9 + $0x28] sm:$0xff] %v827_v52  ;;  %v810_v62 = vmul.f32 %v1326_v43, %v538_v58  ;;  %v1344_v47 = vpop.eup %1343 }
 0x1d7   : > { %843 = vst [vmem:[%s1475_s12 + $0x28] sm:$0xff] %v811_v57  ;;  %v875_v63 = vmul.f32 %v827_v52, %v811_v57  ;;  %858 = vst [vmem:[%s1469_s9 + $0x20] sm:$0xff] %v826_v59  ;;  %v1231_v0 = vpop.f32.mrb[8].mxu0  ;;  %v1346_v51 = vpop.eup %1345 }
 0x1d8   : > { %842 = vst [vmem:[%s1475_s12 + $0x20] sm:$0xff] %v810_v62  ;;  %v874_v2 = vmul.f32 %v826_v59, %v810_v62  ;;  %v1205_v3 = vpop.f32.mrb[6].mxu1  ;;  %v829_v4 = vmul.f32 %v1328_v56, %v1231_v0  ;;  %v693_v5 = vpop.f32.mrb[9].mxu0 }
 0x1d9   : > { %v813_v8 = vmul.f32 %v1328_v56, %v1205_v3  ;;  %v548_v9 = vpop.f32.mrb[7].mxu1  ;;  %v828_v10 = vmul.f32 %v1330_v60, %v693_v5 }
 0x1da   : > { %v1286_v12 = vpack.c.bf16 %v875_v63, %v874_v2  ;;  %861 = vst [vmem:[%s1469_s9 + $0x38] sm:$0xff] %v829_v4  ;;  %v812_v13 = vmul.f32 %v1330_v60, %v548_v9 }
 0x1db   : > { %845 = vst [vmem:[%s1475_s12 + $0x38] sm:$0xff] %v813_v8  ;;  %v1496_v14 = vmul.f32 %v829_v4, %v813_v8  ;;  %860 = vst [vmem:[%s1469_s9 + $0x30] sm:$0xff] %v828_v10  ;;  %v1234_v15 = vpop.f32.mrb[10].mxu0  ;;  %v1358_v4 = vmov 1.0  }
 0x1dc   : > { %1284 = vmatpush3.bf16.xpose.msra.mxu1 %v1283_v61  ;;  %844 = vst [vmem:[%s1475_s12 + $0x30] sm:$0xff] %v812_v13  ;;  %v1500_v17 = vmul.f32 %v828_v10, %v812_v13  ;;  %v1208_v18 = vpop.f32.mrb[8].mxu1  ;;  %v831_v19 = vmul.f32 %v1332_v7, %v1234_v15  ;;  %v703_v20 = vpop.f32.mrb[11].mxu0 }
 0x1dd   : > { %1285 = vmatprep.subr.bf16.mxu1 %v1355_v40  ;;  %v815_v22 = vmul.f32 %v1332_v7, %v1208_v18  ;;  %v558_v23 = vpop.f32.mrb[9].mxu1  ;;  %v830_v24 = vmul.f32 %v1334_v11, %v703_v20 }
 0x1de   : > { %v1289_v25 = vpack.c.bf16 %v1496_v14, %v1500_v17  ;;  %863 = vst [vmem:[%s1469_s9 + $0x48] sm:$0xff] %v831_v19  ;;  %v814_v26 = vmul.f32 %v1334_v11, %v558_v23 }
 0x1df   : > { %847 = vst [vmem:[%s1475_s12 + $0x48] sm:$0xff] %v815_v22  ;;  %v879_v27 = vmul.f32 %v831_v19, %v815_v22  ;;  %862 = vst [vmem:[%s1469_s9 + $0x40] sm:$0xff] %v830_v24  ;;  %v1237_v28 = vpop.f32.mrb[12].mxu0 }
 0x1e0   : > { %846 = vst [vmem:[%s1475_s12 + $0x40] sm:$0xff] %v814_v26  ;;  %v878_v29 = vmul.f32 %v830_v24, %v814_v26  ;;  %v1211_v30 = vpop.f32.mrb[10].mxu1  ;;  %v833_v31 = vmul.f32 %v1336_v16, %v1237_v28  ;;  %v713_v32 = vpop.f32.mrb[13].mxu0 }
 0x1e1   : > { %v817_v34 = vmul.f32 %v1336_v16, %v1211_v30  ;;  %v568_v35 = vpop.f32.mrb[11].mxu1  ;;  %v832_v36 = vmul.f32 %v1338_v21, %v713_v32 }
 0x1e2   : > { %v1292_v38 = vpack.c.bf16 %v879_v27, %v878_v29  ;;  %865 = vst [vmem:[%s1469_s9 + $0x58] sm:$0xff] %v833_v31  ;;  %v816_v39 = vmul.f32 %v1338_v21, %v568_v35 }
 0x1e3   : > { %849 = vst [vmem:[%s1475_s12 + $0x58] sm:$0xff] %v817_v34  ;;  %v881_v41 = vmul.f32 %v833_v31, %v817_v34  ;;  %864 = vst [vmem:[%s1469_s9 + $0x50] sm:$0xff] %v832_v36  ;;  %v1240_v42 = vpop.f32.mrb[14].mxu0 }
 0x1e4   : > { %1287 = vmatpush3.bf16.xpose.msra.mxu1 %v1286_v12  ;;  %848 = vst [vmem:[%s1475_s12 + $0x50] sm:$0xff] %v816_v39  ;;  %v880_v43 = vmul.f32 %v832_v36, %v816_v39  ;;  %v1214_v44 = vpop.f32.mrb[12].mxu1  ;;  %v835_v45 = vmul.f32 %v1340_v33, %v1240_v42  ;;  %v723_v46 = vpop.f32.mrb[15].mxu0 }
 0x1e5   : > { %1288 = vmatprep.subr.bf16.mxu1 %v1355_v40  ;;  %v819_v48 = vmul.f32 %v1340_v33, %v1214_v44  ;;  %v578_v49 = vpop.f32.mrb[13].mxu1  ;;  %v834_v50 = vmul.f32 %v1342_v37, %v723_v46 }
 0x1e6   : > { %v1295_v52 = vpack.c.bf16 %v881_v41, %v880_v43  ;;  %867 = vst [vmem:[%s1469_s9 + $0x68] sm:$0xff] %v835_v45  ;;  %v818_v53 = vmul.f32 %v1342_v37, %v578_v49 }
 0x1e7   : > { %851 = vst [vmem:[%s1475_s12 + $0x68] sm:$0xff] %v819_v48  ;;  %v883_v54 = vmul.f32 %v835_v45, %v819_v48  ;;  %866 = vst [vmem:[%s1469_s9 + $0x60] sm:$0xff] %v834_v50  ;;  %v1243_v55 = vpop.f32.mrb[16].mxu0 }
 0x1e8   : > { %850 = vst [vmem:[%s1475_s12 + $0x60] sm:$0xff] %v818_v53  ;;  %v882_v56 = vmul.f32 %v834_v50, %v818_v53  ;;  %v1217_v57 = vpop.f32.mrb[14].mxu1  ;;  %v837_v58 = vmul.f32 %v1344_v47, %v1243_v55  ;;  %v733_v59 = vpop.f32.mrb[17].mxu0 }
 0x1e9   : > { %v821_v60 = vmul.f32 %v1344_v47, %v1217_v57  ;;  %v588_v61 = vpop.f32.mrb[15].mxu1  ;;  %v836_v62 = vmul.f32 %v1346_v51, %v733_v59 }
 0x1ea   : > { %v1298_v63 = vpack.c.bf16 %v883_v54, %v882_v56  ;;  %869 = vst [vmem:[%s1469_s9 + $0x78] sm:$0xff] %v837_v58  ;;  %v820_v0 = vmul.f32 %v1346_v51, %v588_v61 }
 0x1eb   : > { %853 = vst [vmem:[%s1475_s12 + $0x78] sm:$0xff] %v821_v60  ;;  %v885_v1 = vmul.f32 %v837_v58, %v821_v60  ;;  %868 = vst [vmem:[%s1469_s9 + $0x70] sm:$0xff] %v836_v62 }
 0x1ec   : > { %1290 = vmatpush3.bf16.xpose.msra.mxu1 %v1289_v25  ;;  %852 = vst [vmem:[%s1475_s12 + $0x70] sm:$0xff] %v820_v0  ;;  %v884_v2 = vmul.f32 %v836_v62, %v820_v0 }
 0x1ed   : > { %1291 = vmatprep.subr.bf16.mxu1 %v1355_v40 }
 0x1ee   : > { %v1301_v3 = vpack.c.bf16 %v885_v1, %v884_v2 }
 0x1f4   : > { %1293 = vmatpush3.bf16.xpose.msra.mxu1 %v1292_v38 }
 0x1f5   : > { %1294 = vmatprep.subr.bf16.mxu1 %v1355_v40 }
 0x1fc   : > { %1296 = vmatpush3.bf16.xpose.msra.mxu1 %v1295_v52 }
 0x1fd   : > { %1297 = vmatprep.subr.bf16.mxu1 %v1355_v40 }
 0x204   : > { %1299 = vmatpush3.bf16.xpose.msra.mxu1 %v1298_v63 }
 0x205   : > { %1300 = vmatprep.subr.bf16.mxu1 %v1355_v40 }
 0x20c   : > { %1302 = vmatpush3.bf16.xpose.msra.mxu1 %v1301_v3 }
 0x213   : > { %1277 = vmatmul.mubr.f32.vlgmr.msra.gmra.mrb[16].mxu1 %v1358_v4 }
 0x2e6   : > { %v952_v5 = vpop.f32.mrb[16].mxu1 }
 0x2e7   : > { %956 = vst [vmem:[%s262_s15] sm:$0x1] %v952_v5  ;;  %v1278_v6 = vpop.f32.mrb[17].mxu1 }
 0x2e8 PF: > { %s16_s18 = sadd.s32 1, %s1353_s18  }
 0x2e9   : > { %p13_p4 = scmp.ge.s32.totalorder %s16_s18, 4  }
 0x2eb   :  { %15 = sbr.rel (!%p13_p4) target bundleno = 1 (0x1), region = 89 }

</bundles_post_ra>
